<compile_context>
chip_gen: v5e
topology: v5e:2x2
jax: 0.10.0
libtpu: 0.0.40
codegen_flags: <defaults>
</compile_context>

<pallas_src>
import math

import jax
import jax.numpy as jnp
from jax import lax
from jax.experimental import pallas as pl
from jax.experimental.pallas import tpu as pltpu

# ----------------------------- configuration ------------------------------
B = 2          # batch
S = 8          # sequence length
D_MODEL = 32   # d_model
N_HEADS = 4    # num_heads
D_K = D_MODEL // N_HEADS
D_FF = 64      # feed-forward hidden dim
EPS = 1e-5     # LayerNorm eps (PyTorch default)


# ------------------------------- kernel -----------------------------------
def _layer_norm(h, gamma, beta):
    mu = jnp.mean(h, axis=-1, keepdims=True)
    var = jnp.mean((h - mu) ** 2, axis=-1, keepdims=True)     # biased, like PyTorch
    return (h - mu) * lax.rsqrt(var + EPS) * gamma + beta


def encoder_layer_kernel(
    x_ref, bias_ref,
    wqkv_ref, bqkv_ref, wo_ref, bo_ref,
    g1_ref, be1_ref,
    w1_ref, b1_ref, w2_ref, b2_ref,
    g2_ref, be2_ref,
    out_ref,
):
    x = x_ref[...]                  # (B*S, D)
    bias = bias_ref[...]            # (B, S) additive mask bias: 0 keep / -1e9 pad

    # ---- fused QKV projection: one MXU push with N = 3*D ------------------
    qkv = jnp.dot(x, wqkv_ref[...], preferred_element_type=jnp.float32) + bqkv_ref[...]

    # Scale Q once (O(S*D)) instead of scaling the scores (O(H*S^2)).
    q_all = qkv[:, :D_MODEL] * (1.0 / math.sqrt(D_K))
    k_all = qkv[:, D_MODEL:2 * D_MODEL]
    v_all = qkv[:, 2 * D_MODEL:]

    # ---- multi-head self-attention: unrolled static-slice loops -----------
    ctx_rows = []
    for b in range(B):
        r0, r1 = b * S, (b + 1) * S
        bias_b = bias[b:b + 1, :]                  # (1, S) -> broadcast over queries
        head_outs = []
        for h in range(N_HEADS):
            c0, c1 = h * D_K, (h + 1) * D_K
            q = q_all[r0:r1, c0:c1]                # (S, D_K)
            k = k_all[r0:r1, c0:c1]                # (S, D_K)
            v = v_all[r0:r1, c0:c1]                # (S, D_K)
            # scores = q @ k^T : contract over d_k, no explicit transpose
            s = lax.dot_general(q, k, (((1,), (1,)), ((), ())),
                                preferred_element_type=jnp.float32)    # (S, S)
            s = s + bias_b                          # additive attention mask
            m = jnp.max(s, axis=-1, keepdims=True)
            e = jnp.exp(s - m)
            inv_den = pl.reciprocal(jnp.sum(e, axis=-1, keepdims=True), approx=True)
            p = e * inv_den
            head_outs.append(jnp.dot(p, v, preferred_element_type=jnp.float32))
        ctx_rows.append(jnp.concatenate(head_outs, axis=-1))   # (S, D)
    ctx = jnp.concatenate(ctx_rows, axis=0)                     # (B*S, D)

    attn = jnp.dot(ctx, wo_ref[...], preferred_element_type=jnp.float32) + bo_ref[...]
    # TODO(synk): dropout is identity (eval mode); no RNG masking applied.

    # ---- residual + LayerNorm 1 -------------------------------------------
    h1 = _layer_norm(x + attn, g1_ref[...], be1_ref[...])

    # ---- position-wise feed forward ----------------------------------------
    ff = jnp.dot(h1, w1_ref[...], preferred_element_type=jnp.float32) + b1_ref[...]
    ff = jnp.maximum(ff, 0.0)
    ff = jnp.dot(ff, w2_ref[...], preferred_element_type=jnp.float32) + b2_ref[...]

    # ---- residual + LayerNorm 2 --------------------------------------------
    out_ref[...] = _layer_norm(h1 + ff, g2_ref[...], be2_ref[...])


# ------------------------------- wrapper -----------------------------------
def encoder_layer(x, mask, params):
    """x: (B, S, D) f32; mask: (B, 1, S) f32 with 1 = keep, 0 = padding."""
    (wq, bq, wk, bk, wv, bv, wo, bo,
     g1, be1, w1, b1, w2, b2, g2, be2) = params

    # Wrapper-side plumbing (free): fuse QKV weights, build additive mask bias,
    # flatten (batch, seq) into one 2-D slab of rows for the matmuls.
    wqkv = jnp.concatenate([wq, wk, wv], axis=1)          # (D, 3D)
    bqkv = jnp.concatenate([bq, bk, bv], axis=1)          # (1, 3D)
    bias = ((mask - 1.0) * 1e9).reshape(B, S)             # (B, S)
    x_flat = x.reshape(B * S, D_MODEL)

    vmem = pl.BlockSpec(memory_space=pltpu.MemorySpace.VMEM)
    n_inputs = 14

    out_flat = pl.pallas_call(
        encoder_layer_kernel,
        out_shape=jax.ShapeDtypeStruct((B * S, D_MODEL), jnp.float32),
        in_specs=[vmem] * n_inputs,
        out_specs=vmem,
    )(x_flat, bias, wqkv, bqkv, wo, bo, g1, be1, w1, b1, w2, b2, g2, be2)
    return out_flat.reshape(B, S, D_MODEL)


# --------------------------- pure-JAX reference -----------------------------
def encoder_layer_ref(x, mask, params):
    (wq, bq, wk, bk, wv, bv, wo, bo, g1, be1, w1, b1, w2, b2, g2, be2) = params

    def one(xb, mb):
        q = (xb @ wq + bq[0]).reshape(S, N_HEADS, D_K)
        k = (xb @ wk + bk[0]).reshape(S, N_HEADS, D_K)
        v = (xb @ wv + bv[0]).reshape(S, N_HEADS, D_K)
        scores = jnp.einsum('qhd,khd->hqk', q, k) / math.sqrt(D_K)
        scores = jnp.where(mb[None, :, :] == 0.0, -1e9, scores)
        m = jnp.max(scores, axis=-1, keepdims=True)
        e = jnp.exp(scores - m)
        probs = e / jnp.sum(e, axis=-1, keepdims=True)
        ctx = jnp.einsum('hqk,khd->qhd', probs, v).reshape(S, D_MODEL)
        attn = ctx @ wo + bo[0]
        h = xb + attn
        mu = jnp.mean(h, -1, keepdims=True)
        var = jnp.mean((h - mu) ** 2, -1, keepdims=True)
        h = (h - mu) / jnp.sqrt(var + EPS) * g1[0] + be1[0]
        ff = jnp.maximum(h @ w1 + b1[0], 0.0) @ w2 + b2[0]
        y = h + ff
        mu2 = jnp.mean(y, -1, keepdims=True)
        var2 = jnp.mean((y - mu2) ** 2, -1, keepdims=True)
        return (y - mu2) / jnp.sqrt(var2 + EPS) * g2[0] + be2[0]

    return jax.vmap(one)(x, mask)


# --------------------------------- main -------------------------------------
if __name__ == "__main__":
    key = jax.random.PRNGKey(0)
    ks = jax.random.split(key, 12)

    def w(k, shape, scale=0.05):
        return (scale * jax.random.normal(k, shape)).astype(jnp.float32)

    params = (
        w(ks[0], (D_MODEL, D_MODEL)), jnp.zeros((1, D_MODEL), jnp.float32),   # Wq, bq
        w(ks[1], (D_MODEL, D_MODEL)), jnp.zeros((1, D_MODEL), jnp.float32),   # Wk, bk
        w(ks[2], (D_MODEL, D_MODEL)), jnp.zeros((1, D_MODEL), jnp.float32),   # Wv, bv
        w(ks[3], (D_MODEL, D_MODEL)), jnp.zeros((1, D_MODEL), jnp.float32),   # Wo, bo
        jnp.ones((1, D_MODEL), jnp.float32), jnp.zeros((1, D_MODEL), jnp.float32),  # ln1
        w(ks[4], (D_MODEL, D_FF)), jnp.zeros((1, D_FF), jnp.float32),         # W1, b1
        w(ks[5], (D_FF, D_MODEL)), jnp.zeros((1, D_MODEL), jnp.float32),      # W2, b2
        jnp.ones((1, D_MODEL), jnp.float32), jnp.zeros((1, D_MODEL), jnp.float32),  # ln2
    )

    x = jax.random.normal(ks[6], (B, S, D_MODEL), jnp.float32)
    # src_mask analogue: 1 = real token, 0 = padding (mask last 2 positions of batch 1)
    mask = jnp.ones((B, 1, S), jnp.float32)
    mask = mask.at[1, 0, S - 2:].set(0.0)

    out = encoder_layer(x, mask, params)
    out = jax.block_until_ready(out)

    ref = encoder_layer_ref(x, mask, params)
    assert out.shape == (B, S, D_MODEL)
    # Tolerance covers the EUP approximate reciprocal used in the softmax.
    assert jnp.allclose(out, ref, atol=2e-3, rtol=2e-3), "mismatch vs reference"

    print("KERNEL_OK")
</pallas_src>

<mosaic_0001>
module attributes {stable_mosaic.version = 11 : i64} {
  func.func @encoder_layer_kernel(%arg0: memref<16x32xf32, #tpu.memory_space<vmem>>, %arg1: memref<2x8xf32, #tpu.memory_space<vmem>>, %arg2: memref<32x96xf32, #tpu.memory_space<vmem>>, %arg3: memref<1x96xf32, #tpu.memory_space<vmem>>, %arg4: memref<32x32xf32, #tpu.memory_space<vmem>>, %arg5: memref<1x32xf32, #tpu.memory_space<vmem>>, %arg6: memref<1x32xf32, #tpu.memory_space<vmem>>, %arg7: memref<1x32xf32, #tpu.memory_space<vmem>>, %arg8: memref<32x64xf32, #tpu.memory_space<vmem>>, %arg9: memref<1x64xf32, #tpu.memory_space<vmem>>, %arg10: memref<64x32xf32, #tpu.memory_space<vmem>>, %arg11: memref<1x32xf32, #tpu.memory_space<vmem>>, %arg12: memref<1x32xf32, #tpu.memory_space<vmem>>, %arg13: memref<1x32xf32, #tpu.memory_space<vmem>>, %arg14: memref<16x32xf32, #tpu.memory_space<vmem>>) attributes {dimension_semantics = [], scalar_prefetch = 0 : i64, scratch_operands = 0 : i64, tpu.core_type = #tpu.core_type<tc>} {
    %c0 = arith.constant 0 : index
    %c0_0 = arith.constant 0 : index
    %0 = vector.load %arg0[%c0, %c0_0] : memref<16x32xf32, #tpu.memory_space<vmem>>, vector<16x32xf32>
    %c0_1 = arith.constant 0 : index
    %c0_2 = arith.constant 0 : index
    %1 = vector.load %arg1[%c0_1, %c0_2] : memref<2x8xf32, #tpu.memory_space<vmem>>, vector<2x8xf32>
    %c0_3 = arith.constant 0 : index
    %c0_4 = arith.constant 0 : index
    %2 = vector.load %arg2[%c0_3, %c0_4] : memref<32x96xf32, #tpu.memory_space<vmem>>, vector<32x96xf32>
    %cst = arith.constant dense<0.000000e+00> : vector<16x96xf32>
    %3 = tpu.matmul %0, %2, %cst {dimension_numbers = #tpu.dot_dimension_numbers<[1], [0], [0], [1], [0, 0, 1, 1], [], []>} : vector<16x32xf32>, vector<32x96xf32>, vector<16x96xf32> -> vector<16x96xf32>
    %c0_5 = arith.constant 0 : index
    %c0_6 = arith.constant 0 : index
    %4 = vector.load %arg3[%c0_5, %c0_6] : memref<1x96xf32, #tpu.memory_space<vmem>>, vector<1x96xf32>
    %5 = vector.broadcast %4 : vector<1x96xf32> to vector<16x96xf32>
    %6 = arith.addf %3, %5 : vector<16x96xf32>
    %7 = vector.extract_strided_slice %6 {offsets = [0, 0], sizes = [16, 32], strides = [1, 1]} : vector<16x96xf32> to vector<16x32xf32>
    %cst_7 = arith.constant 0.353553385 : f32
    %8 = vector.broadcast %cst_7 : f32 to vector<16x32xf32>
    %9 = arith.mulf %7, %8 : vector<16x32xf32>
    %10 = vector.extract_strided_slice %6 {offsets = [0, 32], sizes = [16, 32], strides = [1, 1]} : vector<16x96xf32> to vector<16x32xf32>
    %11 = vector.extract_strided_slice %6 {offsets = [0, 64], sizes = [16, 32], strides = [1, 1]} : vector<16x96xf32> to vector<16x32xf32>
    %12 = vector.extract_strided_slice %1 {offsets = [0, 0], sizes = [1, 8], strides = [1, 1]} : vector<2x8xf32> to vector<1x8xf32>
    %13 = vector.extract_strided_slice %9 {offsets = [0, 0], sizes = [8, 8], strides = [1, 1]} : vector<16x32xf32> to vector<8x8xf32>
    %14 = vector.extract_strided_slice %10 {offsets = [0, 0], sizes = [8, 8], strides = [1, 1]} : vector<16x32xf32> to vector<8x8xf32>
    %15 = vector.extract_strided_slice %11 {offsets = [0, 0], sizes = [8, 8], strides = [1, 1]} : vector<16x32xf32> to vector<8x8xf32>
    %cst_8 = arith.constant dense<0.000000e+00> : vector<8x8xf32>
    %16 = tpu.matmul %13, %14, %cst_8 {dimension_numbers = #tpu.dot_dimension_numbers<[1], [1], [0], [0], [0, 0, 1, 0], [], []>} : vector<8x8xf32>, vector<8x8xf32>, vector<8x8xf32> -> vector<8x8xf32>
    %17 = vector.broadcast %12 : vector<1x8xf32> to vector<8x8xf32>
    %18 = arith.addf %16, %17 : vector<8x8xf32>
    %cst_9 = arith.constant dense<0xFF800000> : vector<8xf32>
    %19 = vector.multi_reduction <maximumf>, %18, %cst_9 [1] : vector<8x8xf32> to vector<8xf32>
    %20 = vector.shape_cast %19 : vector<8xf32> to vector<8x1xf32>
    %21 = vector.broadcast %20 : vector<8x1xf32> to vector<8x8xf32>
    %22 = arith.subf %18, %21 : vector<8x8xf32>
    %23 = math.exp %22 : vector<8x8xf32>
    %cst_10 = arith.constant dense<0.000000e+00> : vector<8xf32>
    %24 = vector.multi_reduction <add>, %23, %cst_10 [1] : vector<8x8xf32> to vector<8xf32>
    %25 = vector.shape_cast %24 : vector<8xf32> to vector<8x1xf32>
    %26 = tpu.reciprocal %25 {approx = true} : vector<8x1xf32> -> vector<8x1xf32>
    %27 = vector.broadcast %26 : vector<8x1xf32> to vector<8x8xf32>
    %28 = arith.mulf %23, %27 : vector<8x8xf32>
    %cst_11 = arith.constant dense<0.000000e+00> : vector<8x8xf32>
    %29 = tpu.matmul %28, %15, %cst_11 {dimension_numbers = #tpu.dot_dimension_numbers<[1], [0], [0], [1], [0, 0, 1, 1], [], []>} : vector<8x8xf32>, vector<8x8xf32>, vector<8x8xf32> -> vector<8x8xf32>
    %30 = vector.extract_strided_slice %9 {offsets = [0, 8], sizes = [8, 8], strides = [1, 1]} : vector<16x32xf32> to vector<8x8xf32>
    %31 = vector.extract_strided_slice %10 {offsets = [0, 8], sizes = [8, 8], strides = [1, 1]} : vector<16x32xf32> to vector<8x8xf32>
    %32 = vector.extract_strided_slice %11 {offsets = [0, 8], sizes = [8, 8], strides = [1, 1]} : vector<16x32xf32> to vector<8x8xf32>
    %cst_12 = arith.constant dense<0.000000e+00> : vector<8x8xf32>
    %33 = tpu.matmul %30, %31, %cst_12 {dimension_numbers = #tpu.dot_dimension_numbers<[1], [1], [0], [0], [0, 0, 1, 0], [], []>} : vector<8x8xf32>, vector<8x8xf32>, vector<8x8xf32> -> vector<8x8xf32>
    %34 = vector.broadcast %12 : vector<1x8xf32> to vector<8x8xf32>
    %35 = arith.addf %33, %34 : vector<8x8xf32>
    %cst_13 = arith.constant dense<0xFF800000> : vector<8xf32>
    %36 = vector.multi_reduction <maximumf>, %35, %cst_13 [1] : vector<8x8xf32> to vector<8xf32>
    %37 = vector.shape_cast %36 : vector<8xf32> to vector<8x1xf32>
    %38 = vector.broadcast %37 : vector<8x1xf32> to vector<8x8xf32>
    %39 = arith.subf %35, %38 : vector<8x8xf32>
    %40 = math.exp %39 : vector<8x8xf32>
    %cst_14 = arith.constant dense<0.000000e+00> : vector<8xf32>
    %41 = vector.multi_reduction <add>, %40, %cst_14 [1] : vector<8x8xf32> to vector<8xf32>
    %42 = vector.shape_cast %41 : vector<8xf32> to vector<8x1xf32>
    %43 = tpu.reciprocal %42 {approx = true} : vector<8x1xf32> -> vector<8x1xf32>
    %44 = vector.broadcast %43 : vector<8x1xf32> to vector<8x8xf32>
    %45 = arith.mulf %40, %44 : vector<8x8xf32>
    %cst_15 = arith.constant dense<0.000000e+00> : vector<8x8xf32>
    %46 = tpu.matmul %45, %32, %cst_15 {dimension_numbers = #tpu.dot_dimension_numbers<[1], [0], [0], [1], [0, 0, 1, 1], [], []>} : vector<8x8xf32>, vector<8x8xf32>, vector<8x8xf32> -> vector<8x8xf32>
    %47 = vector.extract_strided_slice %9 {offsets = [0, 16], sizes = [8, 8], strides = [1, 1]} : vector<16x32xf32> to vector<8x8xf32>
    %48 = vector.extract_strided_slice %10 {offsets = [0, 16], sizes = [8, 8], strides = [1, 1]} : vector<16x32xf32> to vector<8x8xf32>
    %49 = vector.extract_strided_slice %11 {offsets = [0, 16], sizes = [8, 8], strides = [1, 1]} : vector<16x32xf32> to vector<8x8xf32>
    %cst_16 = arith.constant dense<0.000000e+00> : vector<8x8xf32>
    %50 = tpu.matmul %47, %48, %cst_16 {dimension_numbers = #tpu.dot_dimension_numbers<[1], [1], [0], [0], [0, 0, 1, 0], [], []>} : vector<8x8xf32>, vector<8x8xf32>, vector<8x8xf32> -> vector<8x8xf32>
    %51 = vector.broadcast %12 : vector<1x8xf32> to vector<8x8xf32>
    %52 = arith.addf %50, %51 : vector<8x8xf32>
    %cst_17 = arith.constant dense<0xFF800000> : vector<8xf32>
    %53 = vector.multi_reduction <maximumf>, %52, %cst_17 [1] : vector<8x8xf32> to vector<8xf32>
    %54 = vector.shape_cast %53 : vector<8xf32> to vector<8x1xf32>
    %55 = vector.broadcast %54 : vector<8x1xf32> to vector<8x8xf32>
    %56 = arith.subf %52, %55 : vector<8x8xf32>
    %57 = math.exp %56 : vector<8x8xf32>
    %cst_18 = arith.constant dense<0.000000e+00> : vector<8xf32>
    %58 = vector.multi_reduction <add>, %57, %cst_18 [1] : vector<8x8xf32> to vector<8xf32>
    %59 = vector.shape_cast %58 : vector<8xf32> to vector<8x1xf32>
    %60 = tpu.reciprocal %59 {approx = true} : vector<8x1xf32> -> vector<8x1xf32>
    %61 = vector.broadcast %60 : vector<8x1xf32> to vector<8x8xf32>
    %62 = arith.mulf %57, %61 : vector<8x8xf32>
    %cst_19 = arith.constant dense<0.000000e+00> : vector<8x8xf32>
    %63 = tpu.matmul %62, %49, %cst_19 {dimension_numbers = #tpu.dot_dimension_numbers<[1], [0], [0], [1], [0, 0, 1, 1], [], []>} : vector<8x8xf32>, vector<8x8xf32>, vector<8x8xf32> -> vector<8x8xf32>
    %64 = vector.extract_strided_slice %9 {offsets = [0, 24], sizes = [8, 8], strides = [1, 1]} : vector<16x32xf32> to vector<8x8xf32>
    %65 = vector.extract_strided_slice %10 {offsets = [0, 24], sizes = [8, 8], strides = [1, 1]} : vector<16x32xf32> to vector<8x8xf32>
    %66 = vector.extract_strided_slice %11 {offsets = [0, 24], sizes = [8, 8], strides = [1, 1]} : vector<16x32xf32> to vector<8x8xf32>
    %cst_20 = arith.constant dense<0.000000e+00> : vector<8x8xf32>
    %67 = tpu.matmul %64, %65, %cst_20 {dimension_numbers = #tpu.dot_dimension_numbers<[1], [1], [0], [0], [0, 0, 1, 0], [], []>} : vector<8x8xf32>, vector<8x8xf32>, vector<8x8xf32> -> vector<8x8xf32>
    %68 = vector.broadcast %12 : vector<1x8xf32> to vector<8x8xf32>
    %69 = arith.addf %67, %68 : vector<8x8xf32>
    %cst_21 = arith.constant dense<0xFF800000> : vector<8xf32>
    %70 = vector.multi_reduction <maximumf>, %69, %cst_21 [1] : vector<8x8xf32> to vector<8xf32>
    %71 = vector.shape_cast %70 : vector<8xf32> to vector<8x1xf32>
    %72 = vector.broadcast %71 : vector<8x1xf32> to vector<8x8xf32>
    %73 = arith.subf %69, %72 : vector<8x8xf32>
    %74 = math.exp %73 : vector<8x8xf32>
    %cst_22 = arith.constant dense<0.000000e+00> : vector<8xf32>
    %75 = vector.multi_reduction <add>, %74, %cst_22 [1] : vector<8x8xf32> to vector<8xf32>
    %76 = vector.shape_cast %75 : vector<8xf32> to vector<8x1xf32>
    %77 = tpu.reciprocal %76 {approx = true} : vector<8x1xf32> -> vector<8x1xf32>
    %78 = vector.broadcast %77 : vector<8x1xf32> to vector<8x8xf32>
    %79 = arith.mulf %74, %78 : vector<8x8xf32>
    %cst_23 = arith.constant dense<0.000000e+00> : vector<8x8xf32>
    %80 = tpu.matmul %79, %66, %cst_23 {dimension_numbers = #tpu.dot_dimension_numbers<[1], [0], [0], [1], [0, 0, 1, 1], [], []>} : vector<8x8xf32>, vector<8x8xf32>, vector<8x8xf32> -> vector<8x8xf32>
    %81 = tpu.concatenate %29, %46, %63, %80 in 1 : vector<8x8xf32>, vector<8x8xf32>, vector<8x8xf32>, vector<8x8xf32> -> vector<8x32xf32>
    %82 = vector.extract_strided_slice %1 {offsets = [1, 0], sizes = [1, 8], strides = [1, 1]} : vector<2x8xf32> to vector<1x8xf32>
    %83 = vector.extract_strided_slice %9 {offsets = [8, 0], sizes = [8, 8], strides = [1, 1]} : vector<16x32xf32> to vector<8x8xf32>
    %84 = vector.extract_strided_slice %10 {offsets = [8, 0], sizes = [8, 8], strides = [1, 1]} : vector<16x32xf32> to vector<8x8xf32>
    %85 = vector.extract_strided_slice %11 {offsets = [8, 0], sizes = [8, 8], strides = [1, 1]} : vector<16x32xf32> to vector<8x8xf32>
    %cst_24 = arith.constant dense<0.000000e+00> : vector<8x8xf32>
    %86 = tpu.matmul %83, %84, %cst_24 {dimension_numbers = #tpu.dot_dimension_numbers<[1], [1], [0], [0], [0, 0, 1, 0], [], []>} : vector<8x8xf32>, vector<8x8xf32>, vector<8x8xf32> -> vector<8x8xf32>
    %87 = vector.broadcast %82 : vector<1x8xf32> to vector<8x8xf32>
    %88 = arith.addf %86, %87 : vector<8x8xf32>
    %cst_25 = arith.constant dense<0xFF800000> : vector<8xf32>
    %89 = vector.multi_reduction <maximumf>, %88, %cst_25 [1] : vector<8x8xf32> to vector<8xf32>
    %90 = vector.shape_cast %89 : vector<8xf32> to vector<8x1xf32>
    %91 = vector.broadcast %90 : vector<8x1xf32> to vector<8x8xf32>
    %92 = arith.subf %88, %91 : vector<8x8xf32>
    %93 = math.exp %92 : vector<8x8xf32>
    %cst_26 = arith.constant dense<0.000000e+00> : vector<8xf32>
    %94 = vector.multi_reduction <add>, %93, %cst_26 [1] : vector<8x8xf32> to vector<8xf32>
    %95 = vector.shape_cast %94 : vector<8xf32> to vector<8x1xf32>
    %96 = tpu.reciprocal %95 {approx = true} : vector<8x1xf32> -> vector<8x1xf32>
    %97 = vector.broadcast %96 : vector<8x1xf32> to vector<8x8xf32>
    %98 = arith.mulf %93, %97 : vector<8x8xf32>
    %cst_27 = arith.constant dense<0.000000e+00> : vector<8x8xf32>
    %99 = tpu.matmul %98, %85, %cst_27 {dimension_numbers = #tpu.dot_dimension_numbers<[1], [0], [0], [1], [0, 0, 1, 1], [], []>} : vector<8x8xf32>, vector<8x8xf32>, vector<8x8xf32> -> vector<8x8xf32>
    %100 = vector.extract_strided_slice %9 {offsets = [8, 8], sizes = [8, 8], strides = [1, 1]} : vector<16x32xf32> to vector<8x8xf32>
    %101 = vector.extract_strided_slice %10 {offsets = [8, 8], sizes = [8, 8], strides = [1, 1]} : vector<16x32xf32> to vector<8x8xf32>
    %102 = vector.extract_strided_slice %11 {offsets = [8, 8], sizes = [8, 8], strides = [1, 1]} : vector<16x32xf32> to vector<8x8xf32>
    %cst_28 = arith.constant dense<0.000000e+00> : vector<8x8xf32>
    %103 = tpu.matmul %100, %101, %cst_28 {dimension_numbers = #tpu.dot_dimension_numbers<[1], [1], [0], [0], [0, 0, 1, 0], [], []>} : vector<8x8xf32>, vector<8x8xf32>, vector<8x8xf32> -> vector<8x8xf32>
    %104 = vector.broadcast %82 : vector<1x8xf32> to vector<8x8xf32>
    %105 = arith.addf %103, %104 : vector<8x8xf32>
    %cst_29 = arith.constant dense<0xFF800000> : vector<8xf32>
    %106 = vector.multi_reduction <maximumf>, %105, %cst_29 [1] : vector<8x8xf32> to vector<8xf32>
    %107 = vector.shape_cast %106 : vector<8xf32> to vector<8x1xf32>
    %108 = vector.broadcast %107 : vector<8x1xf32> to vector<8x8xf32>
    %109 = arith.subf %105, %108 : vector<8x8xf32>
    %110 = math.exp %109 : vector<8x8xf32>
    %cst_30 = arith.constant dense<0.000000e+00> : vector<8xf32>
    %111 = vector.multi_reduction <add>, %110, %cst_30 [1] : vector<8x8xf32> to vector<8xf32>
    %112 = vector.shape_cast %111 : vector<8xf32> to vector<8x1xf32>
    %113 = tpu.reciprocal %112 {approx = true} : vector<8x1xf32> -> vector<8x1xf32>
    %114 = vector.broadcast %113 : vector<8x1xf32> to vector<8x8xf32>
    %115 = arith.mulf %110, %114 : vector<8x8xf32>
    %cst_31 = arith.constant dense<0.000000e+00> : vector<8x8xf32>
    %116 = tpu.matmul %115, %102, %cst_31 {dimension_numbers = #tpu.dot_dimension_numbers<[1], [0], [0], [1], [0, 0, 1, 1], [], []>} : vector<8x8xf32>, vector<8x8xf32>, vector<8x8xf32> -> vector<8x8xf32>
    %117 = vector.extract_strided_slice %9 {offsets = [8, 16], sizes = [8, 8], strides = [1, 1]} : vector<16x32xf32> to vector<8x8xf32>
    %118 = vector.extract_strided_slice %10 {offsets = [8, 16], sizes = [8, 8], strides = [1, 1]} : vector<16x32xf32> to vector<8x8xf32>
    %119 = vector.extract_strided_slice %11 {offsets = [8, 16], sizes = [8, 8], strides = [1, 1]} : vector<16x32xf32> to vector<8x8xf32>
    %cst_32 = arith.constant dense<0.000000e+00> : vector<8x8xf32>
    %120 = tpu.matmul %117, %118, %cst_32 {dimension_numbers = #tpu.dot_dimension_numbers<[1], [1], [0], [0], [0, 0, 1, 0], [], []>} : vector<8x8xf32>, vector<8x8xf32>, vector<8x8xf32> -> vector<8x8xf32>
    %121 = vector.broadcast %82 : vector<1x8xf32> to vector<8x8xf32>
    %122 = arith.addf %120, %121 : vector<8x8xf32>
    %cst_33 = arith.constant dense<0xFF800000> : vector<8xf32>
    %123 = vector.multi_reduction <maximumf>, %122, %cst_33 [1] : vector<8x8xf32> to vector<8xf32>
    %124 = vector.shape_cast %123 : vector<8xf32> to vector<8x1xf32>
    %125 = vector.broadcast %124 : vector<8x1xf32> to vector<8x8xf32>
    %126 = arith.subf %122, %125 : vector<8x8xf32>
    %127 = math.exp %126 : vector<8x8xf32>
    %cst_34 = arith.constant dense<0.000000e+00> : vector<8xf32>
    %128 = vector.multi_reduction <add>, %127, %cst_34 [1] : vector<8x8xf32> to vector<8xf32>
    %129 = vector.shape_cast %128 : vector<8xf32> to vector<8x1xf32>
    %130 = tpu.reciprocal %129 {approx = true} : vector<8x1xf32> -> vector<8x1xf32>
    %131 = vector.broadcast %130 : vector<8x1xf32> to vector<8x8xf32>
    %132 = arith.mulf %127, %131 : vector<8x8xf32>
    %cst_35 = arith.constant dense<0.000000e+00> : vector<8x8xf32>
    %133 = tpu.matmul %132, %119, %cst_35 {dimension_numbers = #tpu.dot_dimension_numbers<[1], [0], [0], [1], [0, 0, 1, 1], [], []>} : vector<8x8xf32>, vector<8x8xf32>, vector<8x8xf32> -> vector<8x8xf32>
    %134 = vector.extract_strided_slice %9 {offsets = [8, 24], sizes = [8, 8], strides = [1, 1]} : vector<16x32xf32> to vector<8x8xf32>
    %135 = vector.extract_strided_slice %10 {offsets = [8, 24], sizes = [8, 8], strides = [1, 1]} : vector<16x32xf32> to vector<8x8xf32>
    %136 = vector.extract_strided_slice %11 {offsets = [8, 24], sizes = [8, 8], strides = [1, 1]} : vector<16x32xf32> to vector<8x8xf32>
    %cst_36 = arith.constant dense<0.000000e+00> : vector<8x8xf32>
    %137 = tpu.matmul %134, %135, %cst_36 {dimension_numbers = #tpu.dot_dimension_numbers<[1], [1], [0], [0], [0, 0, 1, 0], [], []>} : vector<8x8xf32>, vector<8x8xf32>, vector<8x8xf32> -> vector<8x8xf32>
    %138 = vector.broadcast %82 : vector<1x8xf32> to vector<8x8xf32>
    %139 = arith.addf %137, %138 : vector<8x8xf32>
    %cst_37 = arith.constant dense<0xFF800000> : vector<8xf32>
    %140 = vector.multi_reduction <maximumf>, %139, %cst_37 [1] : vector<8x8xf32> to vector<8xf32>
    %141 = vector.shape_cast %140 : vector<8xf32> to vector<8x1xf32>
    %142 = vector.broadcast %141 : vector<8x1xf32> to vector<8x8xf32>
    %143 = arith.subf %139, %142 : vector<8x8xf32>
    %144 = math.exp %143 : vector<8x8xf32>
    %cst_38 = arith.constant dense<0.000000e+00> : vector<8xf32>
    %145 = vector.multi_reduction <add>, %144, %cst_38 [1] : vector<8x8xf32> to vector<8xf32>
    %146 = vector.shape_cast %145 : vector<8xf32> to vector<8x1xf32>
    %147 = tpu.reciprocal %146 {approx = true} : vector<8x1xf32> -> vector<8x1xf32>
    %148 = vector.broadcast %147 : vector<8x1xf32> to vector<8x8xf32>
    %149 = arith.mulf %144, %148 : vector<8x8xf32>
    %cst_39 = arith.constant dense<0.000000e+00> : vector<8x8xf32>
    %150 = tpu.matmul %149, %136, %cst_39 {dimension_numbers = #tpu.dot_dimension_numbers<[1], [0], [0], [1], [0, 0, 1, 1], [], []>} : vector<8x8xf32>, vector<8x8xf32>, vector<8x8xf32> -> vector<8x8xf32>
    %151 = tpu.concatenate %99, %116, %133, %150 in 1 : vector<8x8xf32>, vector<8x8xf32>, vector<8x8xf32>, vector<8x8xf32> -> vector<8x32xf32>
    %152 = tpu.concatenate %81, %151 in 0 : vector<8x32xf32>, vector<8x32xf32> -> vector<16x32xf32>
    %c0_40 = arith.constant 0 : index
    %c0_41 = arith.constant 0 : index
    %153 = vector.load %arg4[%c0_40, %c0_41] : memref<32x32xf32, #tpu.memory_space<vmem>>, vector<32x32xf32>
    %cst_42 = arith.constant dense<0.000000e+00> : vector<16x32xf32>
    %154 = tpu.matmul %152, %153, %cst_42 {dimension_numbers = #tpu.dot_dimension_numbers<[1], [0], [0], [1], [0, 0, 1, 1], [], []>} : vector<16x32xf32>, vector<32x32xf32>, vector<16x32xf32> -> vector<16x32xf32>
    %c0_43 = arith.constant 0 : index
    %c0_44 = arith.constant 0 : index
    %155 = vector.load %arg5[%c0_43, %c0_44] : memref<1x32xf32, #tpu.memory_space<vmem>>, vector<1x32xf32>
    %156 = vector.broadcast %155 : vector<1x32xf32> to vector<16x32xf32>
    %157 = arith.addf %154, %156 : vector<16x32xf32>
    %158 = arith.addf %0, %157 : vector<16x32xf32>
    %c0_45 = arith.constant 0 : index
    %c0_46 = arith.constant 0 : index
    %159 = vector.load %arg6[%c0_45, %c0_46] : memref<1x32xf32, #tpu.memory_space<vmem>>, vector<1x32xf32>
    %c0_47 = arith.constant 0 : index
    %c0_48 = arith.constant 0 : index
    %160 = vector.load %arg7[%c0_47, %c0_48] : memref<1x32xf32, #tpu.memory_space<vmem>>, vector<1x32xf32>
    %cst_49 = arith.constant dense<0.000000e+00> : vector<16xf32>
    %161 = vector.multi_reduction <add>, %158, %cst_49 [1] : vector<16x32xf32> to vector<16xf32>
    %162 = vector.shape_cast %161 : vector<16xf32> to vector<16x1xf32>
    %cst_50 = arith.constant 3.200000e+01 : f32
    %163 = vector.broadcast %cst_50 : f32 to vector<16x1xf32>
    %164 = arith.divf %162, %163 : vector<16x1xf32>
    %165 = vector.broadcast %164 : vector<16x1xf32> to vector<16x32xf32>
    %166 = arith.subf %158, %165 : vector<16x32xf32>
    %167 = arith.mulf %166, %166 : vector<16x32xf32>
    %cst_51 = arith.constant dense<0.000000e+00> : vector<16xf32>
    %168 = vector.multi_reduction <add>, %167, %cst_51 [1] : vector<16x32xf32> to vector<16xf32>
    %169 = vector.shape_cast %168 : vector<16xf32> to vector<16x1xf32>
    %cst_52 = arith.constant 3.200000e+01 : f32
    %170 = vector.broadcast %cst_52 : f32 to vector<16x1xf32>
    %171 = arith.divf %169, %170 : vector<16x1xf32>
    %172 = vector.broadcast %164 : vector<16x1xf32> to vector<16x32xf32>
    %173 = arith.subf %158, %172 : vector<16x32xf32>
    %cst_53 = arith.constant 9.99999974E-6 : f32
    %174 = vector.broadcast %cst_53 : f32 to vector<16x1xf32>
    %175 = arith.addf %171, %174 : vector<16x1xf32>
    %176 = math.rsqrt %175 : vector<16x1xf32>
    %177 = vector.broadcast %176 : vector<16x1xf32> to vector<16x32xf32>
    %178 = arith.mulf %173, %177 : vector<16x32xf32>
    %179 = vector.broadcast %159 : vector<1x32xf32> to vector<16x32xf32>
    %180 = arith.mulf %178, %179 : vector<16x32xf32>
    %181 = vector.broadcast %160 : vector<1x32xf32> to vector<16x32xf32>
    %182 = arith.addf %180, %181 : vector<16x32xf32>
    %c0_54 = arith.constant 0 : index
    %c0_55 = arith.constant 0 : index
    %183 = vector.load %arg8[%c0_54, %c0_55] : memref<32x64xf32, #tpu.memory_space<vmem>>, vector<32x64xf32>
    %cst_56 = arith.constant dense<0.000000e+00> : vector<16x64xf32>
    %184 = tpu.matmul %182, %183, %cst_56 {dimension_numbers = #tpu.dot_dimension_numbers<[1], [0], [0], [1], [0, 0, 1, 1], [], []>} : vector<16x32xf32>, vector<32x64xf32>, vector<16x64xf32> -> vector<16x64xf32>
    %c0_57 = arith.constant 0 : index
    %c0_58 = arith.constant 0 : index
    %185 = vector.load %arg9[%c0_57, %c0_58] : memref<1x64xf32, #tpu.memory_space<vmem>>, vector<1x64xf32>
    %186 = vector.broadcast %185 : vector<1x64xf32> to vector<16x64xf32>
    %187 = arith.addf %184, %186 : vector<16x64xf32>
    %cst_59 = arith.constant 0.000000e+00 : f32
    %188 = vector.broadcast %cst_59 : f32 to vector<16x64xf32>
    %189 = arith.maximumf %187, %188 : vector<16x64xf32>
    %c0_60 = arith.constant 0 : index
    %c0_61 = arith.constant 0 : index
    %190 = vector.load %arg10[%c0_60, %c0_61] : memref<64x32xf32, #tpu.memory_space<vmem>>, vector<64x32xf32>
    %cst_62 = arith.constant dense<0.000000e+00> : vector<16x32xf32>
    %191 = tpu.matmul %189, %190, %cst_62 {dimension_numbers = #tpu.dot_dimension_numbers<[1], [0], [0], [1], [0, 0, 1, 1], [], []>} : vector<16x64xf32>, vector<64x32xf32>, vector<16x32xf32> -> vector<16x32xf32>
    %c0_63 = arith.constant 0 : index
    %c0_64 = arith.constant 0 : index
    %192 = vector.load %arg11[%c0_63, %c0_64] : memref<1x32xf32, #tpu.memory_space<vmem>>, vector<1x32xf32>
    %193 = vector.broadcast %192 : vector<1x32xf32> to vector<16x32xf32>
    %194 = arith.addf %191, %193 : vector<16x32xf32>
    %195 = arith.addf %182, %194 : vector<16x32xf32>
    %c0_65 = arith.constant 0 : index
    %c0_66 = arith.constant 0 : index
    %196 = vector.load %arg12[%c0_65, %c0_66] : memref<1x32xf32, #tpu.memory_space<vmem>>, vector<1x32xf32>
    %c0_67 = arith.constant 0 : index
    %c0_68 = arith.constant 0 : index
    %197 = vector.load %arg13[%c0_67, %c0_68] : memref<1x32xf32, #tpu.memory_space<vmem>>, vector<1x32xf32>
    %cst_69 = arith.constant dense<0.000000e+00> : vector<16xf32>
    %198 = vector.multi_reduction <add>, %195, %cst_69 [1] : vector<16x32xf32> to vector<16xf32>
    %199 = vector.shape_cast %198 : vector<16xf32> to vector<16x1xf32>
    %cst_70 = arith.constant 3.200000e+01 : f32
    %200 = vector.broadcast %cst_70 : f32 to vector<16x1xf32>
    %201 = arith.divf %199, %200 : vector<16x1xf32>
    %202 = vector.broadcast %201 : vector<16x1xf32> to vector<16x32xf32>
    %203 = arith.subf %195, %202 : vector<16x32xf32>
    %204 = arith.mulf %203, %203 : vector<16x32xf32>
    %cst_71 = arith.constant dense<0.000000e+00> : vector<16xf32>
    %205 = vector.multi_reduction <add>, %204, %cst_71 [1] : vector<16x32xf32> to vector<16xf32>
    %206 = vector.shape_cast %205 : vector<16xf32> to vector<16x1xf32>
    %cst_72 = arith.constant 3.200000e+01 : f32
    %207 = vector.broadcast %cst_72 : f32 to vector<16x1xf32>
    %208 = arith.divf %206, %207 : vector<16x1xf32>
    %209 = vector.broadcast %201 : vector<16x1xf32> to vector<16x32xf32>
    %210 = arith.subf %195, %209 : vector<16x32xf32>
    %cst_73 = arith.constant 9.99999974E-6 : f32
    %211 = vector.broadcast %cst_73 : f32 to vector<16x1xf32>
    %212 = arith.addf %208, %211 : vector<16x1xf32>
    %213 = math.rsqrt %212 : vector<16x1xf32>
    %214 = vector.broadcast %213 : vector<16x1xf32> to vector<16x32xf32>
    %215 = arith.mulf %210, %214 : vector<16x32xf32>
    %216 = vector.broadcast %196 : vector<1x32xf32> to vector<16x32xf32>
    %217 = arith.mulf %215, %216 : vector<16x32xf32>
    %218 = vector.broadcast %197 : vector<1x32xf32> to vector<16x32xf32>
    %219 = arith.addf %217, %218 : vector<16x32xf32>
    %c0_74 = arith.constant 0 : index
    %c0_75 = arith.constant 0 : index
    %220 = vector.load %arg14[%c0_74, %c0_75] : memref<16x32xf32, #tpu.memory_space<vmem>>, vector<16x32xf32>
    tpu.vector_store %arg14[%c0_74, %c0_75], %219 {strides = array<i32>} : memref<16x32xf32, #tpu.memory_space<vmem>>, vector<16x32xf32>,
    return
  }
}

</mosaic_0001>

<bundles_post_ra>
// kernel: tpu_custom_call.1
= control target key start
LH: loop header
LB: loop body
LE: loop exit
PB: predicated region body
PF: predicated region fallthrough
CT: control target
= control target key end

     0   :  { %19 = vsyncpa [#allocation3], 0  ;;  %s1468_s0 = inlined_call_operand.hbm [shape: f32[16,32], index: 0, kind: input, shape index: {}]   ;;  %s1469_s1 = inlined_call_operand.hbm [shape: f32[2,8], index: 1, kind: input, shape index: {}]   ;;  %s1470_s2 = inlined_call_operand.vmem [shape: f32[32,96], index: 2, kind: input, shape index: {}]   ;;  %s1471_s3 = inlined_call_operand.vmem [shape: f32[1,96], index: 3, kind: input, shape index: {}]   ;;  %s1472_s4 = inlined_call_operand.vmem [shape: f32[32,32], index: 4, kind: input, shape index: {}]   ;;  %s1473_s5 = inlined_call_operand.vmem [shape: f32[1,32], index: 5, kind: input, shape index: {}]   ;;  %s1474_s6 = inlined_call_operand.vmem [shape: f32[1,32], index: 6, kind: input, shape index: {}]   ;;  %s1475_s7 = inlined_call_operand.vmem [shape: f32[1,32], index: 7, kind: input, shape index: {}]   ;;  %s1476_s8 = inlined_call_operand.vmem [shape: f32[32,64], index: 8, kind: input, shape index: {}]   ;;  %s1477_s9 = inlined_call_operand.vmem [shape: f32[1,64], index: 9, kind: input, shape index: {}]   ;;  %s1478_s10 = inlined_call_operand.vmem [shape: f32[64,32], index: 10, kind: input, shape index: {}]   ;;  %s1479_s11 = inlined_call_operand.vmem [shape: f32[1,32], index: 11, kind: input, shape index: {}]   ;;  %s1480_s12 = inlined_call_operand.vmem [shape: f32[1,32], index: 12, kind: input, shape index: {}]   ;;  %s1481_s13 = inlined_call_operand.vmem [shape: f32[1,32], index: 13, kind: input, shape index: {}]   ;;  %s1482_s14 = inlined_call_operand.hbm [shape: f32[16,32], index: 14, kind: output, shape index: {}]  }
   0x1   :  { %20 = vsyncpa [#allocation6], 0 }
   0x2   :  { %21 = vsyncpa [#allocation4], 0  ;;  %s26_s15 = sshll.u32 %s1468_s0, 4  ;;  %s1118_s16 = smov [#allocation2]   ;;  %s27_s15 = int_to_ptr.hbm [resolvable:$true] %s26_s15 }
   0x3   :  { %s28_s17 = sshll.u32 %s1118_s16, 4  ;;  %s40_s20 = sshll.u32 %s1469_s1, 4  ;;  %s29_s17 = int_to_ptr.vmem [resolvable:$true] %s28_s17  ;;  %s41_s20 = int_to_ptr.hbm [resolvable:$true] %s40_s20 }
   0x4   :  { %s1119_s21 = smov 128   ;;  %s1120_s22 = smov 8  }
   0x5   :  { %34 = dma.hbm_to_vmem [thread:$0]  %s27_s15, 256, %s29_s17, [#allocation3], %s1119_s21, %s1119_s21, %s1120_s22  }
   0x6   :  { %s1121_s23 = smov [#allocation5]  }
   0x7   :  { %s42_s24 = sshll.u32 %s1121_s23, 4  ;;  %s43_s24 = int_to_ptr.vmem [resolvable:$true] %s42_s24 }
   0x8   :  { %45 = dma.hbm_to_vmem [thread:$0]  %s41_s20, 32, %s43_s24, [#allocation6]  }
   0x9   :  { %1112 = dma.done.wait [#allocation3], 256  }
   0xa   :  { %1113 = vsyncadd [#allocation3], 4294967040 }
   0xb   :  { %1114 = dma.done.wait [#allocation6], 32  }
   0xc   :  { %1115 = vsyncadd [#allocation6], 4294967264  ;;  %v84_v0 = vld [vmem:[%s1470_s2 + $0x18] sm:$0xff]  ;;  %v83_v1 = vld [vmem:[%s1470_s2 + $0x10] sm:$0xff]  ;;  %vm89_vm0 = vcmask 261120   ;;  %s1122_s17 = smov 96  }
   0xd   :  { %108 = vmatpush.msra.mxu0 %v84_v0  ;;  %v82_v2 = vld [vmem:[%s1470_s2 + $0x8] sm:$0xff]  ;;  %v81_v3 = vld [vmem:[%s1470_s2] sm:$0xff]  ;;  %s1123_s2 = smov 120   ;;  %s1124_s18 = smov 64   ;;  %vm125_vm1 = vcmask 64512   ;;  %vm396_vm2 = vcmask 130048  }
   0xe   :  { %v1233_v4 = vld [vmem:[#allocation2] sm:$0xff]  ;;  %s1126_s19 = smov 112   ;;  %v1262_v13 = vld [vmem:[#allocation5] sm:$0x3]  ;;  %s1127_s20 = smov 88   ;;  %v1280_v32 = vld [vmem:[#allocation2 + $0x8] sm:$0xff] }
   0xf   :  { %109 = vmatpush.msra.mxu0 %v83_v1  ;;  %v1240_v5 = vld [vmem:[%s1471_s3] ss:$0 sm:$0xff]  ;;  %s1125_s3 = smov 80   ;;  %v1265_v14 = vperm.slane %v1262_v13, 0  ;;  %s1128_s23 = smov 48   ;;  %vm398_vm3 = vcmask 195584  }
  0x10   :  { %s1129_s24 = smov 72   ;;  %s1130_s0 = smov 56   ;;  %vm829_vm8 = vcmask 523264  }
  0x11   :  { %110 = vmatpush.msra.mxu0 %v82_v2  ;;  %s1131_s25 = smov 104   ;;  %s1132_s1 = smov 40  }
  0x12   :  { %s1133_s26 = smov 16   ;;  %s1134_s27 = smov 24  }
  0x13   :  { %111 = vmatpush.msra.mxu0 %v81_v3  ;;  %s925_s29 = sshll.u32 %s1482_s14, 4  ;;  %s926_s29 = int_to_ptr.hbm [resolvable:$true] %s925_s29 }
  0x14   :  { %939 = vmatmul.msk.f32.vlgmr.msra.gmra.mxu0 %vm89_vm0, %v1233_v4 }
  0x1c   :  { %940 = vmatmul.msk.f32.gmra.mxu0 %vm89_vm0, %v1280_v32 }
  0x91   :  { %v113_v6 = vpop.f32.mrf.mxu0 }
  0x92   :  { %v1243_v7 = vadd.f32 %v1240_v5, %v113_v6 }
  0x94   :  { %123 = vrot.lane.b32.xlu0 %v1243_v7, %s1122_s17  ;;  %v1248_v8 = vmul.f32 0.35355338, %v1243_v7 }
  0x96   :  { %188 = vrot.lane.b32.xlu2 %v1248_v8, %s1123_s2 }
  0x99   :  { %v116_v40 = vpop.f32.mrf.mxu0 }
  0x9a   :  { %v1290_v41 = vadd.f32 %v1240_v5, %v116_v40 }
  0x9c   :  { %v120_v43 = vmul.f32 0.35355338, %v1290_v41 }
  0x9e   :  { %162 = vrot.lane.b32.xlu2 %v1243_v7, %s1124_s18 }
  0xa6   :  { %255 = vrot.lane.b32.xlu2 %v1243_v7, %s1125_s3 }
  0xae   :  { %253 = vrot.lane.b32.xlu2 %v1248_v8, %s1126_s19 }
  0xf0   :  { %v189_v9 = vpop.permute.xlu2 %188 }
  0xf8   :  { %v163_v10 = vpop.permute.xlu2 %162 }
 0x100   :  { %v256_v12 = vpop.permute.xlu2 %255 }
 0x106   :  { %v124_v11 = vpop.permute.xlu0 %123 }
 0x107   :  { %941 = vmatpush.xpose.msk.msra.mxu1 %vm125_vm1, %v124_v11 }
 0x108   :  { %v254_v26 = vpop.permute.xlu2 %253 }
 0x10a   :  { %942 = vmatmul.msk.f32.vlgmr.msra.gmra.mxu1 %vm125_vm1, %v1248_v8 }
 0x10b   :  { %183 = vmatpush.msrb.mxu1 %v163_v10 }
 0x10d   :  { %947 = vmatpush.xpose.msk.msra.mxu1 %vm125_vm1, %v256_v12 }
 0x187   :  { %v148_v15 = vpop.f32.mrf.mxu1 }
 0x188   :  { %v149_v16 = vadd.f32 %v148_v15, %v1265_v14 }
 0x18a   :  { %v151_v17 = vsel %vm125_vm1, %v149_v16, -inf }
 0x18b   :  { %152 = vmax.xlane.f32.xlu0 %v151_v17 }
 0x1fe   :  { %v153_v18 = vpop.xlane.xlu0 %152 }
 0x1ff   :  { %v154_v19 = vsub.f32 %v149_v16, %v153_v18 }
 0x201   :  { %v155_v20 = vmul.f32 1.442695, %v154_v19 }
 0x203   :  { %998 = vpow2.f32 %v155_v20 }
 0x209   :  { %v999_v21 = vpop.eup %998 }
 0x20a   :  { %v157_v22 = vsel %vm125_vm1, %v999_v21, 0.0 }
 0x20b   :  { %158 = vadd.xlane.f32.xlu1 %v157_v22 }
 0x224   :  { %190 = vrot.lane.b32.xlu1 %v1243_v7, %s1127_s20 }
 0x27e   :  { %v159_v23 = vpop.xlane.xlu1 %158 }
 0x27f   :  { %1000 = vrcp.f32 %v159_v23 }
 0x285   :  { %v1001_v24 = vpop.eup %1000 }
 0x286   :  { %v161_v25 = vmul.f32 %v1001_v24, %v999_v21 }
 0x288   :  { %943 = vmatmul.msk.f32.vlgmr.msrb.gmra.mxu1 %vm125_vm1, %v161_v25 }
 0x290   :  { %948 = vmatmul.msk.f32.vlgmr.msra.gmra.mxu1 %vm125_vm1, %v254_v26 }
 0x296   :  { %v191_v27 = vpop.permute.xlu1 %190 }
 0x297   :  { %944 = vmatpush.xpose.msk.msra.mxu3 %vm125_vm1, %v191_v27 }
 0x29a   :  { %945 = vmatmul.msk.f32.vlgmr.msra.gmra.mxu3 %vm125_vm1, %v189_v9 }
 0x305   :  { %v1276_v28 = vpop.f32.mrf.mxu1 }
 0x30d   :  { %v278_v29 = vpop.f32.mrf.mxu1 }
 0x30e   :  { %v279_v30 = vadd.f32 %v278_v29, %v1265_v14 }
 0x310   :  { %v281_v31 = vsel %vm125_vm1, %v279_v30, -inf }
 0x311   :  { %282 = vmax.xlane.f32.xlu1 %v281_v31 }
 0x31d   :  { %v213_v33 = vpop.f32.mrf.mxu3 }
 0x31e   :  { %v214_v34 = vadd.f32 %v213_v33, %v1265_v14 }
 0x320   :  { %v216_v35 = vsel %vm125_vm1, %v214_v34, -inf }
 0x321   :  { %217 = vmax.xlane.f32.xlu2 %v216_v35 }
 0x32a   :  { %292 = vrot.lane.b32.xlu1 %v1243_v7, %s1128_s23 }
 0x332   :  { %466 = vrot.lane.b32.xlu1 %v120_v43, %s1123_s2 }
 0x339   :  { %320 = vrot.lane.b32.xlu2 %v1243_v7, %s1129_s24 }
 0x33a   :  { %531 = vrot.lane.b32.xlu1 %v120_v43, %s1126_s19 }
 0x341   :  { %468 = vrot.lane.b32.xlu2 %v1290_v41, %s1127_s20 }
 0x349   :  { %598 = vrot.lane.b32.xlu2 %v1290_v41, %s1129_s24 }
 0x384   :  { %v283_v36 = vpop.xlane.xlu1 %282 }
 0x385   :  { %v284_v46 = vsub.f32 %v279_v30, %v283_v36 }
 0x387   :  { %v285_v47 = vmul.f32 1.442695, %v284_v46 }
 0x394   :  { %v218_v37 = vpop.xlane.xlu2 %217 }
 0x395   :  { %v219_v38 = vsub.f32 %v214_v34, %v218_v37 }
 0x397   :  { %v220_v39 = vmul.f32 1.442695, %v219_v38 }
 0x399   :  { %1002 = vpow2.f32 %v220_v39 }
 0x39a   :  { %1004 = vpow2.f32 %v285_v47 }
 0x39c   :  { %v293_v42 = vpop.permute.xlu1 %292  ;;  %v321_v51 = vpop.permute.xlu2 %320 }
 0x39d   :  { %313 = vmatpush.msrb.mxu3 %v293_v42 }
 0x39f   :  { %v1003_v44 = vpop.eup %1002 }
 0x3a0   :  { %v222_v45 = vsel %vm125_vm1, %v1003_v44, 0.0  ;;  %v1005_v48 = vpop.eup %1004 }
 0x3a1   :  { %223 = vadd.xlane.f32.xlu0 %v222_v45  ;;  %v287_v49 = vsel %vm125_vm1, %v1005_v48, 0.0 }
 0x3a4   :  { %v469_v53 = vpop.permute.xlu2 %468  ;;  %v467_v59 = vpop.permute.xlu1 %466 }
 0x3ac   :  { %v599_v57 = vpop.permute.xlu2 %598  ;;  %v532_v1 = vpop.permute.xlu1 %531 }
 0x3b5   :  { %227 = vrot.lane.b32.xlu0 %v1243_v7, %s1130_s0 }
 0x3bd   :  { %318 = vrot.lane.b32.xlu0 %v1248_v8, %s1131_s25  ;;  %v400_v8 = vperm.slane %v1262_v13, 1 }
 0x3c5   :  { %402 = vrot.lane.b32.xlu0 %v1290_v41, %s1122_s17 }
 0x3cd   :  { %533 = vrot.lane.b32.xlu0 %v1290_v41, %s1125_s3 }
 0x3f7   :  { %288 = vadd.xlane.f32.xlu0 %v287_v49 }
 0x40b   :  { %596 = vrot.lane.b32.xlu0 %v120_v43, %s1131_s25 }
 0x414   :  { %v224_v50 = vpop.xlane.xlu0 %223 }
 0x415   :  { %1006 = vrcp.f32 %v224_v50 }
 0x41b   :  { %v1007_v52 = vpop.eup %1006 }
 0x41c   :  { %v226_v55 = vmul.f32 %v1007_v52, %v1003_v44 }
 0x427   :  { %v228_v54 = vpop.permute.xlu0 %227 }
 0x428   :  { %248 = vmatpush.msra.mxu2 %v228_v54 }
 0x429   :  { %946 = vmatmul.msk.f32.vlgmr.msra.gmra.mxu2 %vm125_vm1, %v226_v55 }
 0x42a   :  { %950 = vmatpush.xpose.msk.msrb.mxu2 %vm125_vm1, %v321_v51 }
 0x42e   :  { %956 = vmatpush.xpose.msk.msra.mxu2 %vm125_vm1, %v469_v53 }
 0x42f   :  { %v319_v56 = vpop.permute.xlu0 %318 }
 0x431   :  { %951 = vmatmul.msk.f32.vlgmr.msrb.gmra.mxu2 %vm125_vm1, %v319_v56 }
 0x432   :  { %962 = vmatpush.xpose.msk.msrb.mxu2 %vm125_vm1, %v599_v57 }
 0x437   :  { %v403_v58 = vpop.permute.xlu0 %402 }
 0x438   :  { %953 = vmatpush.xpose.msk.msra.mxu3 %vm125_vm1, %v403_v58 }
 0x439   :  { %957 = vmatmul.msk.f32.vlgmr.msra.gmra.mxu2 %vm125_vm1, %v467_v59 }
 0x43f   :  { %v534_v60 = vpop.permute.xlu0 %533 }
 0x46a   :  { %v289_v61 = vpop.xlane.xlu0 %288 }
 0x46b   :  { %1008 = vrcp.f32 %v289_v61  ;;  %v679_v61 = vld [vmem:[%s1472_s4 + $0x18] sm:$0xff] }
 0x471   :  { %v1009_v62 = vpop.eup %1008 }
 0x472   :  { %v291_v63 = vmul.f32 %v1009_v62, %v1005_v48  ;;  %v678_v62 = vld [vmem:[%s1472_s4 + $0x10] sm:$0xff] }
 0x474   :  { %949 = vmatmul.msk.f32.vlgmr.msrb.gmra.mxu3 %vm125_vm1, %v291_v63  ;;  %v677_v63 = vld [vmem:[%s1472_s4 + $0x8] sm:$0xff] }
 0x475   :  { %959 = vmatpush.xpose.msk.msrb.mxu3 %vm125_vm1, %v534_v60 }
 0x47c   :  { %954 = vmatmul.msk.f32.vlgmr.msra.gmra.mxu3 %vm125_vm1, %v120_v43 }
 0x47d   :  { %v597_v0 = vpop.permute.xlu0 %596  ;;  %702 = vmatpush.msra.mxu3 %v679_v61 }
 0x47e   :  { %963 = vmatmul.msk.f32.vlgmr.msrb.gmra.mxu2 %vm125_vm1, %v597_v0 }
 0x47f   :  { %703 = vmatpush.msra.mxu3 %v678_v62 }
 0x481   :  { %704 = vmatpush.msra.mxu3 %v677_v63  ;;  %v993_v63 = vld [vmem:[%s1475_s7] ss:$0 sm:$0xff] }
 0x484   :  { %960 = vmatmul.msk.f32.vlgmr.msrb.gmra.mxu3 %vm125_vm1, %v532_v1 }
 0x4ac   :  { %v250_v2 = vpop.f32.mrf.mxu2 }
 0x4b4   :  { %v343_v3 = vpop.f32.mrf.mxu2 }
 0x4b5   :  { %v344_v5 = vadd.f32 %v343_v3, %v1265_v14 }
 0x4b7   :  { %v346_v6 = vsel %vm125_vm1, %v344_v5, -inf }
 0x4b8   :  { %347 = vmax.xlane.f32.xlu2 %v346_v6 }
 0x4bc   :  { %v491_v9 = vpop.f32.mrf.mxu2 }
 0x4bd   :  { %v492_v10 = vadd.f32 %v491_v9, %v400_v8 }
 0x4bf   :  { %v494_v11 = vsel %vm125_vm1, %v492_v10, -inf }
 0x4c0   :  { %495 = vmax.xlane.f32.xlu0 %v494_v11 }
 0x4f7   :  { %v315_v12 = vpop.f32.mrf.mxu3 }
 0x4ff   :  { %v426_v15 = vpop.f32.mrf.mxu3 }
 0x500   :  { %v427_v16 = vadd.f32 %v426_v15, %v400_v8 }
 0x501   :  { %v621_v18 = vpop.f32.mrf.mxu2 }
 0x502   :  { %v429_v17 = vsel %vm125_vm1, %v427_v16, -inf  ;;  %v622_v19 = vadd.f32 %v621_v18, %v400_v8 }
 0x503   :  { %430 = vmax.xlane.f32.xlu1 %v429_v17 }
 0x504   :  { %v624_v14 = vsel %vm125_vm1, %v622_v19, -inf }
 0x507   :  { %v556_v37 = vpop.f32.mrf.mxu3 }
 0x508   :  { %v557_v39 = vadd.f32 %v556_v37, %v400_v8  ;;  %v676_v8 = vld [vmem:[%s1472_s4] sm:$0xff] }
 0x509   :  { %705 = vmatpush.msra.mxu3 %v676_v8 }
 0x50a   :  { %v559_v40 = vsel %vm125_vm1, %v557_v39, -inf }
 0x50b   :  { %625 = vmax.xlane.f32.xlu1 %v624_v14 }
 0x52b   :  { %v348_v20 = vpop.xlane.xlu2 %347 }
 0x52c   :  { %v349_v21 = vsub.f32 %v344_v5, %v348_v20 }
 0x52e   :  { %v350_v22 = vmul.f32 1.442695, %v349_v21 }
 0x530   :  { %1010 = vpow2.f32 %v350_v22 }
 0x533   :  { %v496_v13 = vpop.xlane.xlu0 %495 }
 0x534   :  { %v497_v23 = vsub.f32 %v492_v10, %v496_v13 }
 0x536   :  { %v1011_v24 = vpop.eup %1010  ;;  %v498_v25 = vmul.f32 1.442695, %v497_v23 }
 0x537   :  { %v352_v26 = vsel %vm125_vm1, %v1011_v24, 0.0 }
 0x538   :  { %1012 = vpow2.f32 %v498_v25  ;;  %353 = vadd.xlane.f32.xlu0 %v352_v26 }
 0x53e   :  { %v1326_v27 = vpop.eup %1012 }
 0x53f   :  { %v500_v29 = vsel %vm125_vm1, %v1326_v27, 0.0 }
 0x540   :  { %501 = vadd.xlane.f32.xlu1 %v500_v29 }
 0x54c   :  { %357 = vrot.lane.b32.xlu0 %v1243_v7, %s1132_s1 }
 0x554   :  { %570 = vrot.lane.b32.xlu0 %v1290_v41, %s1128_s23 }
 0x559   :  { %440 = vrot.lane.b32.xlu1 %v1290_v41, %s1124_s18 }
 0x55c   :  { %635 = vrot.lane.b32.xlu0 %v1290_v41, %s1132_s1 }
 0x561   :  { %384 = vrot.lane.b32.xlu1 %v250_v2, %s1120_s22 }
 0x564   :  { %388 = vrot.lane.b32.xlu0 %v315_v12, %s1133_s26 }
 0x576   :  { %v431_v30 = vpop.xlane.xlu1 %430 }
 0x577   :  { %v432_v7 = vsub.f32 %v427_v16, %v431_v30 }
 0x579   :  { %v433_v38 = vmul.f32 1.442695, %v432_v7 }
 0x57e   :  { %v626_v31 = vpop.xlane.xlu1 %625 }
 0x57f   :  { %v627_v33 = vsub.f32 %v622_v19, %v626_v31 }
 0x581   :  { %v628_v34 = vmul.f32 1.442695, %v627_v33  ;;  %v1135_v33 = vmov 32.0  }
 0x583   :  { %1014 = vpow2.f32 %v628_v34 }
 0x584   :  { %1016 = vpow2.f32 %v433_v38 }
 0x589   :  { %v1338_v35 = vpop.eup %1014 }
 0x58a   :  { %v630_v36 = vsel %vm125_vm1, %v1338_v35, 0.0  ;;  %v1017_v42 = vpop.eup %1016 }
 0x58b   :  { %631 = vadd.xlane.f32.xlu2 %v630_v36  ;;  %v435_v43 = vsel %vm125_vm1, %v1017_v42, 0.0 }
 0x593   :  { %560 = vmax.xlane.f32.xlu2 %v559_v40 }
 0x59b   :  { %436 = vadd.xlane.f32.xlu2 %v435_v43 }
 0x5ab   :  { %v354_v44 = vpop.xlane.xlu0 %353 }
 0x5ac   :  { %1018 = vrcp.f32 %v354_v44 }
 0x5b2   :  { %v1019_v45 = vpop.eup %1018 }
 0x5b3   :  { %v356_v46 = vmul.f32 %v1019_v45, %v1011_v24  ;;  %v502_v48 = vpop.xlane.xlu1 %501 }
 0x5be   :  { %v358_v47 = vpop.permute.xlu0 %357 }
 0x5bf   :  { %378 = vmatpush.msrb.mxu1 %v358_v47 }
 0x5c0   :  { %952 = vmatmul.msk.f32.vlgmr.msrb.gmra.mxu1 %vm125_vm1, %v356_v46 }
 0x5c6   :  { %v571_v50 = vpop.permute.xlu0 %570 }
 0x5cb   :  { %v441_v49 = vpop.permute.xlu1 %440 }
 0x5cc   :  { %461 = vmatpush.msrb.mxu0 %v441_v49  ;;  %v780_v49 = vld [vmem:[%s1476_s8 + $0x10] sm:$0xff] }
 0x5ce   :  { %591 = vmatpush.msra.mxu0 %v571_v50  ;;  %v636_v6 = vpop.permute.xlu0 %635  ;;  %v779_v50 = vld [vmem:[%s1476_s8 + $0x8] sm:$0xff] }
 0x5d3   :  { %v385_v11 = vpop.permute.xlu1 %384 }
 0x5d4   :  { %v395_v15 = vsel %vm125_vm1, %v1276_v28, %v385_v11  ;;  %v991_v28 = vld [vmem:[%s1473_s5] ss:$0 sm:$0xff] }
 0x5d6   :  { %v389_v12 = vpop.permute.xlu0 %388 }
 0x5d7   :  { %v397_v16 = vsel %vm396_vm2, %v395_v15, %v389_v12  ;;  %v819_v15 = vld [vmem:[%s1478_s10 + $0x10] sm:$0xff] }
 0x5fe   :  { %v632_v51 = vpop.xlane.xlu2 %631 }
 0x606   :  { %v561_v52 = vpop.xlane.xlu2 %560 }
 0x607   :  { %v562_v53 = vsub.f32 %v557_v39, %v561_v52 }
 0x609   :  { %v563_v54 = vmul.f32 1.442695, %v562_v53 }
 0x60b   :  { %1020 = vpow2.f32 %v563_v54 }
 0x60e   :  { %v437_v55 = vpop.xlane.xlu2 %436 }
 0x60f   :  { %1022 = vrcp.f32 %v437_v55 }
 0x610   :  { %1024 = vrcp.f32 %v502_v48  ;;  %v781_v48 = vld [vmem:[%s1476_s8 + $0x18] sm:$0xff] }
 0x611   :  { %v1021_v56 = vpop.eup %1020 }
 0x612   :  { %v565_v57 = vsel %vm125_vm1, %v1021_v56, 0.0 }
 0x613   :  { %566 = vadd.xlane.f32.xlu2 %v565_v57 }
 0x615   :  { %v1023_v58 = vpop.eup %1022 }
 0x616   :  { %v439_v59 = vmul.f32 %v1023_v58, %v1017_v42  ;;  %v1025_v0 = vpop.eup %1024 }
 0x617   :  { %v504_v2 = vmul.f32 %v1025_v0, %v1326_v27 }
 0x618   :  { %955 = vmatmul.msk.f32.vlgmr.msrb.gmra.mxu0 %vm125_vm1, %v439_v59 }
 0x619   :  { %804 = vmatpush.msrb.mxu0 %v781_v48 }
 0x61b   :  { %805 = vmatpush.msrb.mxu0 %v780_v49 }
 0x61d   :  { %806 = vmatpush.msrb.mxu0 %v779_v50 }
 0x62b   :  { %505 = vrot.lane.b32.xlu2 %v1290_v41, %s1130_s0 }
 0x63d   :  { %v380_v60 = vpop.f32.mrf.mxu1 }
 0x63e   :  { %392 = vrot.lane.b32.xlu1 %v380_v60, %s1134_s27  ;;  %v992_v60 = vld [vmem:[%s1474_s6] ss:$0 sm:$0xff] }
 0x686   :  { %v567_v41 = vpop.xlane.xlu2 %566 }
 0x687   :  { %1026 = vrcp.f32 %v567_v41 }
 0x688   :  { %1028 = vrcp.f32 %v632_v51 }
 0x689   :  { %1030 = vrcp.f32 %v1135_v33 }
 0x68d   :  { %v1027_v1 = vpop.eup %1026 }
 0x68e   :  { %v569_v3 = vmul.f32 %v1027_v1, %v1021_v56  ;;  %v506_v5 = vpop.permute.xlu2 %505  ;;  %v1029_v9 = vpop.eup %1028  ;;  %v824_v1 = vld [vmem:[%s1478_s10 + $0x38] sm:$0xff] }
 0x68f   :  { %526 = vmatpush.msra.mxu1 %v506_v5  ;;  %v634_v10 = vmul.f32 %v1029_v9, %v1338_v35  ;;  %v1031_v34 = vpop.eup %1030  ;;  %844 = vmatpush.msra.mxu2 %v824_v1  ;;  %v821_v5 = vld [vmem:[%s1478_s10 + $0x20] sm:$0xff] }
 0x690   :  { %958 = vmatmul.msk.f32.vlgmr.msra.gmra.mxu1 %vm125_vm1, %v504_v2  ;;  %961 = vmatmul.msk.f32.vlgmr.msra.gmra.mxu0 %vm125_vm1, %v569_v3  ;;  %v724_v35 = vmul.f32 32.0, %v1031_v34  ;;  %vm728_vm4 = vweird.f32 %v1031_v34  ;;  %v823_v2 = vld [vmem:[%s1478_s10 + $0x30] sm:$0xff]  ;;  %v822_v3 = vld [vmem:[%s1478_s10 + $0x28] sm:$0xff] }
 0x691   :  { %656 = vmatpush.msrb.mxu1 %v636_v6  ;;  %845 = vmatpush.msra.mxu2 %v823_v2  ;;  %v820_v6 = vld [vmem:[%s1478_s10 + $0x18] sm:$0xff] }
 0x692   :  { %v725_v7 = vsub.f32 1.0, %v724_v35 }
 0x693   :  { %846 = vmatpush.msra.mxu2 %v822_v3 }
 0x695   :  { %v463_v19 = vpop.f32.mrf.mxu0  ;;  %847 = vmatpush.msra.mxu2 %v821_v5 }
 0x697   :  { %848 = vmatpush.msra.mxu2 %v820_v6 }
 0x698   :  { %964 = vmatmul.msk.f32.vlgmr.msrb.gmra.mxu1 %vm125_vm1, %v634_v10 }
 0x699   :  { %849 = vmatpush.msra.mxu2 %v819_v15 }
 0x6b0   :  { %v393_v17 = vpop.permute.xlu1 %392 }
 0x6b1   :  { %v399_v18 = vsel %vm398_vm3, %v397_v16, %v393_v17  ;;  %v818_v16 = vld [vmem:[%s1478_s10 + $0x8] sm:$0xff]  ;;  %v817_v17 = vld [vmem:[%s1478_s10] sm:$0xff] }
 0x6b2   :  { %965 = vmatmul.msk.f32.vlgmr.msra.gmra.mxu3 %vm89_vm0, %v399_v18  ;;  %850 = vmatpush.msra.mxu2 %v818_v16  ;;  %v994_v18 = vld [vmem:[%s1477_s9] ss:$0 sm:$0xff] }
 0x6b4   :  { %851 = vmatpush.msra.mxu2 %v817_v17 }
 0x70d   :  { %v528_v14 = vpop.f32.mrf.mxu1  ;;  %v593_v20 = vpop.f32.mrf.mxu0 }
 0x70e   :  { %662 = vrot.lane.b32.xlu2 %v528_v14, %s1120_s22  ;;  %666 = vrot.lane.b32.xlu0 %v593_v20, %s1133_s26 }
 0x715   :  { %v658_v21 = vpop.f32.mrf.mxu1 }
 0x716   :  { %670 = vrot.lane.b32.xlu1 %v658_v21, %s1134_s27 }
 0x735   :  { %v707_v22 = vpop.f32.mrf.mxu3 }
 0x736   :  { %v708_v13 = vadd.f32 %v991_v28, %v707_v22 }
 0x738   :  { %v713_v23 = vadd.f32 %v708_v13, %v1233_v4  ;;  %v726_v4 = vmul.f32 %v1031_v34, %v725_v7 }
 0x73a   :  { %v717_v24 = vsel %vm89_vm0, %v713_v23, 0.0  ;;  %v727_v36 = vadd.f32 %v1031_v34, %v726_v4 }
 0x73b   :  { %718 = vadd.xlane.f32.xlu2 %v717_v24 }
 0x73c   :  { %v1384_v37 = vsel %vm728_vm4, %v1031_v34, %v727_v36  ;;  %v995_v34 = vld [vmem:[%s1479_s11] ss:$0 sm:$0xff] }
 0x768   :  { %v663_v25 = vpop.permute.xlu2 %662 }
 0x769   :  { %v673_v27 = vsel %vm125_vm1, %v463_v19, %v663_v25 }
 0x780   :  { %v667_v26 = vpop.permute.xlu0 %666 }
 0x781   :  { %v674_v29 = vsel %vm396_vm2, %v673_v27, %v667_v26 }
 0x788   :  { %v671_v30 = vpop.permute.xlu1 %670 }
 0x789   :  { %v675_v31 = vsel %vm398_vm3, %v674_v29, %v671_v30 }
 0x78a   :  { %966 = vmatmul.msk.f32.gmra.mxu3 %vm89_vm0, %v675_v31 }
 0x7ae   :  { %v719_v38 = vpop.xlane.xlu2 %718 }
 0x7af   :  { %v730_v39 = vmul.f32 %v1384_v37, %v719_v38 }
 0x7b1   :  { %v732_v40 = vsub.f32 %v713_v23, %v730_v39 }
 0x7b3   :  { %v734_v42 = vmul.f32 %v732_v40, %v732_v40 }
 0x7b5   :  { %v736_v43 = vsel %vm89_vm0, %v734_v42, 0.0 }
 0x7b6   :  { %737 = vadd.xlane.f32.xlu1 %v736_v43 }
 0x80d   :  { %v710_v44 = vpop.f32.mrf.mxu3 }
 0x80e   :  { %v711_v45 = vadd.f32 %v991_v28, %v710_v44 }
 0x810   :  { %v714_v46 = vadd.f32 %v711_v45, %v1280_v32  ;;  %v778_v32 = vld [vmem:[%s1476_s8] sm:$0xff] }
 0x811   :  { %807 = vmatpush.msrb.mxu0 %v778_v32 }
 0x812   :  { %v720_v47 = vsel %vm89_vm0, %v714_v46, 0.0 }
 0x813   :  { %721 = vadd.xlane.f32.xlu0 %v720_v47 }
 0x829   :  { %v738_v51 = vpop.xlane.xlu1 %737 }
 0x82a   :  { %v742_v52 = vmul.f32 %v738_v51, %v1384_v37 }
 0x82c   :  { %v744_v53 = vadd.f32 1e-05, %v742_v52 }
 0x82e   :  { %1032 = vrsqrt.f32 %v744_v53  ;;  %vm752_vm6 = vweird.f32 %v744_v53 }
 0x834   :  { %v1033_v54 = vpop.eup %1032 }
 0x835   :  { %v747_v55 = vmul.f32 %v1033_v54, %v744_v53  ;;  %vm753_vm5 = vweird.f32 %v1033_v54 }
 0x836   :  { %vm754_vm7 = vmor %vm752_vm6, %vm753_vm5 }
 0x837   :  { %v748_v56 = vmul.f32 %v1033_v54, %v747_v55 }
 0x839   :  { %v749_v57 = vmul.f32 0.5, %v748_v56 }
 0x83b   :  { %v750_v58 = vsub.f32 1.5, %v749_v57 }
 0x83d   :  { %v751_v59 = vmul.f32 %v1033_v54, %v750_v58 }
 0x83f   :  { %v755_v61 = vsel %vm754_vm7, %v1033_v54, %v751_v59  ;;  %v996_v59 = vld [vmem:[%s1480_s12] ss:$0 sm:$0xff]  ;;  %s1136_s12 = smov [#allocation7]  }
 0x840   :  { %v766_v62 = vmul.f32 %v755_v61, %v732_v40 }
 0x842   :  { %v771_v41 = vmul.f32 %v992_v60, %v766_v62  ;;  %v997_v62 = vld [vmem:[%s1481_s13] ss:$0 sm:$0xff]  ;;  %s923_s13 = sshll.u32 %s1136_s12, 4  ;;  %s924_s13 = int_to_ptr.vmem [resolvable:$true] %s923_s13 }
 0x844   :  { %v776_v0 = vadd.f32 %v993_v63, %v771_v41 }
 0x846   :  { %967 = vmatmul.msk.f32.vlgmr.msrb.gmra.mxu0 %vm89_vm0, %v776_v0 }
 0x886   :  { %v722_v8 = vpop.xlane.xlu0 %721 }
 0x887   :  { %v731_v9 = vmul.f32 %v1384_v37, %v722_v8 }
 0x889   :  { %v733_v10 = vsub.f32 %v714_v46, %v731_v9 }
 0x88b   :  { %v735_v11 = vmul.f32 %v733_v10, %v733_v10 }
 0x88d   :  { %v739_v12 = vsel %vm89_vm0, %v735_v11, 0.0 }
 0x88e   :  { %740 = vadd.xlane.f32.xlu2 %v739_v12 }
 0x8c3   :  { %v809_v19 = vpop.f32.mrf.mxu0 }
 0x8c4   :  { %v810_v14 = vadd.f32 %v994_v18, %v809_v19 }
 0x8c6   :  { %v815_v20 = vmax.f32 %v810_v14, 0.0 }
 0x8c8   :  { %969 = vmatmul.msk.f32.vlgmr.msra.gmra.mxu2 %vm829_vm8, %v815_v20 }
 0x901   :  { %v741_v21 = vpop.xlane.xlu2 %740 }
 0x902   :  { %v743_v28 = vmul.f32 %v741_v21, %v1384_v37 }
 0x904   :  { %v745_v22 = vadd.f32 1e-05, %v743_v28 }
 0x906   :  { %1034 = vrsqrt.f32 %v745_v22  ;;  %vm762_vm10 = vweird.f32 %v745_v22 }
 0x90c   :  { %v1035_v13 = vpop.eup %1034 }
 0x90d   :  { %v757_v23 = vmul.f32 %v1035_v13, %v745_v22  ;;  %vm763_vm9 = vweird.f32 %v1035_v13 }
 0x90e   :  { %vm764_vm11 = vmor %vm762_vm10, %vm763_vm9 }
 0x90f   :  { %v758_v24 = vmul.f32 %v1035_v13, %v757_v23 }
 0x911   :  { %v759_v25 = vmul.f32 0.5, %v758_v24 }
 0x913   :  { %v760_v26 = vsub.f32 1.5, %v759_v25 }
 0x915   :  { %v761_v27 = vmul.f32 %v1035_v13, %v760_v26 }
 0x917   :  { %v765_v29 = vsel %vm764_vm11, %v1035_v13, %v761_v27 }
 0x918   :  { %v767_v30 = vmul.f32 %v765_v29, %v733_v10 }
 0x91a   :  { %v772_v31 = vmul.f32 %v992_v60, %v767_v30 }
 0x91c   :  { %v777_v33 = vadd.f32 %v993_v63, %v772_v31 }
 0x91e   :  { %968 = vmatmul.msk.f32.gmra.mxu0 %vm89_vm0, %v777_v33 }
 0x94b   :  { %v853_v35 = vpop.f32.mrf.mxu2 }
 0x94c   :  { %v854_v7 = vadd.f32 %v995_v34, %v853_v35 }
 0x94e   :  { %v859_v4 = vadd.f32 %v854_v7, %v776_v0 }
 0x950   :  { %v863_v36 = vsel %vm89_vm0, %v859_v4, 0.0 }
 0x951   :  { %864 = vadd.xlane.f32.xlu0 %v863_v36 }
 0x99b   :  { %v812_v38 = vpop.f32.mrf.mxu0 }
 0x99c   :  { %v813_v39 = vadd.f32 %v994_v18, %v812_v38 }
 0x99e   :  { %v816_v40 = vmax.f32 %v813_v39, 0.0 }
 0x9a0   :  { %970 = vmatmul.msk.f32.gmra.mxu2 %vm829_vm8, %v816_v40 }
 0x9c4   :  { %v865_v42 = vpop.xlane.xlu0 %864 }
 0x9c5   :  { %v869_v43 = vmul.f32 %v865_v42, %v1384_v37 }
 0x9c7   :  { %v871_v44 = vsub.f32 %v859_v4, %v869_v43 }
 0x9c9   :  { %v873_v45 = vmul.f32 %v871_v44, %v871_v44 }
 0x9cb   :  { %v875_v46 = vsel %vm89_vm0, %v873_v45, 0.0 }
 0x9cc   :  { %876 = vadd.xlane.f32.xlu2 %v875_v46 }
 0xa23   :  { %v856_v47 = vpop.f32.mrf.mxu2 }
 0xa24   :  { %v857_v48 = vadd.f32 %v995_v34, %v856_v47 }
 0xa26   :  { %v860_v49 = vadd.f32 %v857_v48, %v777_v33 }
 0xa28   :  { %v866_v50 = vsel %vm89_vm0, %v860_v49, 0.0 }
 0xa29   :  { %867 = vadd.xlane.f32.xlu1 %v866_v50 }
 0xa3f   :  { %v877_v32 = vpop.xlane.xlu2 %876 }
 0xa40   :  { %v881_v51 = vmul.f32 %v877_v32, %v1384_v37 }
 0xa42   :  { %v883_v52 = vadd.f32 1e-05, %v881_v51 }
 0xa44   :  { %1036 = vrsqrt.f32 %v883_v52  ;;  %vm891_vm13 = vweird.f32 %v883_v52 }
 0xa4a   :  { %v1037_v53 = vpop.eup %1036 }
 0xa4b   :  { %v886_v54 = vmul.f32 %v1037_v53, %v883_v52  ;;  %vm892_vm12 = vweird.f32 %v1037_v53 }
 0xa4c   :  { %vm893_vm14 = vmor %vm891_vm13, %vm892_vm12 }
 0xa4d   :  { %v887_v55 = vmul.f32 %v1037_v53, %v886_v54 }
 0xa4f   :  { %v888_v56 = vmul.f32 0.5, %v887_v55 }
 0xa51   :  { %v889_v57 = vsub.f32 1.5, %v888_v56 }
 0xa53   :  { %v890_v58 = vmul.f32 %v1037_v53, %v889_v57 }
 0xa55   :  { %v894_v60 = vsel %vm893_vm14, %v1037_v53, %v890_v58 }
 0xa56   :  { %v905_v61 = vmul.f32 %v894_v60, %v871_v44 }
 0xa58   :  { %v910_v63 = vmul.f32 %v996_v59, %v905_v61 }
 0xa5a   :  { %v915_v41 = vadd.f32 %v997_v62, %v910_v63 }
 0xa5c   :  { %917 = vst.msk [vmem:[#allocation7] sm:$0xff] %vm89_vm0, %v915_v41 }
 0xa9c   :  { %v868_v0 = vpop.xlane.xlu1 %867 }
 0xa9d   :  { %v870_v1 = vmul.f32 %v868_v0, %v1384_v37 }
 0xa9f   :  { %v872_v2 = vsub.f32 %v860_v49, %v870_v1 }
 0xaa1   :  { %v874_v3 = vmul.f32 %v872_v2, %v872_v2 }
 0xaa3   :  { %v878_v5 = vsel %vm89_vm0, %v874_v3, 0.0 }
 0xaa4   :  { %879 = vadd.xlane.f32.xlu0 %v878_v5 }
 0xb17   :  { %v880_v6 = vpop.xlane.xlu0 %879 }
 0xb18   :  { %v882_v8 = vmul.f32 %v880_v6, %v1384_v37 }
 0xb1a   :  { %v884_v9 = vadd.f32 1e-05, %v882_v8 }
 0xb1c   :  { %1038 = vrsqrt.f32 %v884_v9  ;;  %vm901_vm1 = vweird.f32 %v884_v9 }
 0xb22   :  { %v1039_v10 = vpop.eup %1038 }
 0xb23   :  { %v896_v11 = vmul.f32 %v1039_v10, %v884_v9  ;;  %vm902_vm15 = vweird.f32 %v1039_v10 }
 0xb24   :  { %vm903_vm2 = vmor %vm901_vm1, %vm902_vm15 }
 0xb25   :  { %v897_v12 = vmul.f32 %v1039_v10, %v896_v11 }
 0xb27   :  { %v898_v15 = vmul.f32 0.5, %v897_v12 }
 0xb29   :  { %v899_v16 = vsub.f32 1.5, %v898_v15 }
 0xb2b   :  { %v900_v17 = vmul.f32 %v1039_v10, %v899_v16 }
 0xb2d   :  { %v904_v18 = vsel %vm903_vm2, %v1039_v10, %v900_v17 }
 0xb2e   :  { %v906_v19 = vmul.f32 %v904_v18, %v872_v2 }
 0xb30   :  { %v911_v37 = vmul.f32 %v996_v59, %v906_v19 }
 0xb32   :  { %v916_v14 = vadd.f32 %v997_v62, %v911_v37 }
 0xb34   :  { %918 = vst.msk [vmem:[#allocation7 + $0x8] sm:$0xff] %vm89_vm0, %v916_v14 }
 0xb35   :  { %931 = dma.vmem_to_hbm [thread:$0]  %s924_s13, 256, %s926_s29, [#allocation4], %s1119_s21, %s1119_s21, %s1120_s22  }
 0xb36   :  { %1116 = dma.done.wait [#allocation4], 256  }
 0xb37   :  { %1117 = vsyncadd [#allocation4], 4294967040 }
 0xb38   :  { %936 = vsyncpa [#allocation3], 1 }
 0xb39   :  { %937 = vsyncpa [#allocation6], 1 }
 0xb3a   :  { %938 = vsyncpa [#allocation4], 1 }

</bundles_post_ra>
